<compile_context>
chip_gen: v7x
topology: tpu7x:2x2x1
jax: 0.10.0
libtpu: 0.0.40
codegen_flags: <defaults>
</compile_context>

<pallas_src>
import functools

import jax
import jax.numpy as jnp
from jax import lax
from jax.experimental import pallas as pl
from jax.experimental.pallas import tpu as pltpu

EMB = 40          # embedding dim  (nn.Embedding(input_dim, 40))
HID = 25          # LSTM hidden size
HID_PAD = 32      # hidden padded to 32 lanes per gate slot
GATES_PAD = 4 * HID_PAD   # 128 lanes: [i | f | g | o], each 32 lanes (25 real + 7 zero)


def lstm_head_kernel(x_ref, wih_ref, whh_ref, b_ref, wl_ref, bl_ref, o_ref, *, bp):
    """Full LSTM recurrence + linear head + sigmoid in one program.

    x_ref:   (T*bp, E)        time-major embedded inputs (batch padded to bp rows/step)
    wih_ref: (E, 128)         fused input->gate weights, gate slots of 32 lanes (i,f,g,o)
    whh_ref: (32, 128)        fused hidden->gate weights (rows 25..31 zero)
    b_ref:   (1, 128)         combined bias b_ih + b_hh, padded lanes zero
    wl_ref:  (1, 32)          final linear weight row, padded lanes zero
    bl_ref:  (1, 1)           final linear bias
    o_ref:   (bp, 1)          sigmoid(logits)
    """
    T = x_ref.shape[0] // bp
    HP = HID_PAD
    GP = GATES_PAD

    # ---- hoisted input projection: one matmul for all timesteps ----
    x_proj = (jnp.dot(x_ref[...], wih_ref[...], preferred_element_type=jnp.float32)
              + b_ref[...])                                        # (T*bp, 128)

    whh = whh_ref[...]                                             # (32, 128)

    # lane mask selecting the g-gate slot (tanh); everything else gets sigmoid
    lane = lax.broadcasted_iota(jnp.int32, (bp, GP), 1)
    is_g = (lane >= 2 * HP) & (lane < 3 * HP)

    h = jnp.zeros((bp, HP), jnp.float32)
    c = jnp.zeros((bp, HP), jnp.float32)

    # T is small and static: fully unroll so slices are static and steps interleave.
    for t in range(T):
        gates = (x_proj[t * bp:(t + 1) * bp, :]
                 + jnp.dot(h, whh, preferred_element_type=jnp.float32))   # (bp, 128)
        # 2 full-vreg EUP launches instead of 5 small ones
        act = jnp.where(is_g, jnp.tanh(gates), jax.nn.sigmoid(gates))
        i_g = act[:, 0 * HP:1 * HP]
        f_g = act[:, 1 * HP:2 * HP]
        g_g = act[:, 2 * HP:3 * HP]
        o_g = act[:, 3 * HP:4 * HP]
        c = f_g * c + i_g * g_g
        h = o_g * jnp.tanh(c)

    # Linear(25, 1): VPU multiply + lane reduction (padded lanes are zero), not a
    # 1-column MXU matmul.
    logits = jnp.sum(h * wl_ref[...], axis=-1, keepdims=True) + bl_ref[...]
    o_ref[...] = jax.nn.sigmoid(logits)


def pack_params(params):
    """Pack PyTorch-layout LSTM/linear params into fused, lane-padded kernel weights."""
    H, HP, GP = HID, HID_PAD, GATES_PAD
    w_ih = params["weight_ih"].astype(jnp.float32)        # (4H, E), gate order i,f,g,o
    w_hh = params["weight_hh"].astype(jnp.float32)        # (4H, H)
    bias = (params["bias_ih"] + params["bias_hh"]).astype(jnp.float32)   # (4H,)
    E = w_ih.shape[1]

    wih_p = jnp.zeros((E, GP), jnp.float32)
    whh_p = jnp.zeros((HP, GP), jnp.float32)
    b_p = jnp.zeros((1, GP), jnp.float32)
    for k in range(4):
        wih_p = wih_p.at[:, k * HP:k * HP + H].set(w_ih[k * H:(k + 1) * H, :].T)
        whh_p = whh_p.at[:H, k * HP:k * HP + H].set(w_hh[k * H:(k + 1) * H, :].T)
        b_p = b_p.at[0, k * HP:k * HP + H].set(bias[k * H:(k + 1) * H])

    wl_p = jnp.zeros((1, HP), jnp.float32).at[0, :H].set(params["w_lin"][0].astype(jnp.float32))
    bl_p = params["b_lin"].reshape(1, 1).astype(jnp.float32)
    return wih_p, whh_p, b_p, wl_p, bl_p


def model_forward(tokens, params):
    """tokens: (B, T) int32 indices. Returns (B, 1) float32 sigmoid outputs."""
    B, T = tokens.shape
    Bp = max(8, ((B + 7) // 8) * 8)           # pad batch to a sublane multiple

    # Embedding gather directly in time-major order (no gather-then-transpose).
    emb = params["embedding"].astype(jnp.float32)
    x = jnp.take(emb, tokens.T, axis=0)                       # (T, B, E)
    x = jnp.pad(x, ((0, 0), (0, Bp - B), (0, 0)))             # (T, Bp, E), pad rows zero
    x = x.reshape(T * Bp, EMB)                                # time-major flat

    wih_p, whh_p, b_p, wl_p, bl_p = pack_params(params)

    vmem = pl.BlockSpec(memory_space=pltpu.MemorySpace.VMEM)
    out = pl.pallas_call(
        functools.partial(lstm_head_kernel, bp=Bp),
        out_shape=jax.ShapeDtypeStruct((Bp, 1), jnp.float32),
        in_specs=[vmem] * 6,
        out_specs=vmem,
    )(x, wih_p, whh_p, b_p, wl_p, bl_p)
    return out[:B]


def reference_forward(tokens, params):
    """Pure-JAX reference mirroring PyTorch nn.LSTM semantics (gate order i,f,g,o)."""
    emb = jnp.take(params["embedding"].astype(jnp.float32), tokens, axis=0)   # (B, T, E)
    B, T = tokens.shape
    H = HID
    w_ih = params["weight_ih"]
    w_hh = params["weight_hh"]
    b = params["bias_ih"] + params["bias_hh"]
    h = jnp.zeros((B, H), jnp.float32)
    c = jnp.zeros((B, H), jnp.float32)
    for t in range(T):
        xt = emb[:, t, :]
        z = xt @ w_ih.T + h @ w_hh.T + b
        i_g = jax.nn.sigmoid(z[:, 0 * H:1 * H])
        f_g = jax.nn.sigmoid(z[:, 1 * H:2 * H])
        g_g = jnp.tanh(z[:, 2 * H:3 * H])
        o_g = jax.nn.sigmoid(z[:, 3 * H:4 * H])
        c = f_g * c + i_g * g_g
        h = o_g * jnp.tanh(c)
    return jax.nn.sigmoid(h @ params["w_lin"].T + params["b_lin"])


if __name__ == "__main__":
    vocab = 16   # input_dim
    B, T = 2, 8

    key = jax.random.PRNGKey(0)
    ks = jax.random.split(key, 9)
    scale = 1.0 / jnp.sqrt(jnp.float32(HID))

    params = {
        # nn.Embedding default init ~ N(0, 1)
        "embedding": jax.random.normal(ks[0], (vocab, EMB), jnp.float32),
        # nn.LSTM default init ~ U(-1/sqrt(H), 1/sqrt(H)); PyTorch layout (4H, in), gates i,f,g,o
        "weight_ih": jax.random.uniform(ks[1], (4 * HID, EMB), jnp.float32, -scale, scale),
        "weight_hh": jax.random.uniform(ks[2], (4 * HID, HID), jnp.float32, -scale, scale),
        "bias_ih":   jax.random.uniform(ks[3], (4 * HID,), jnp.float32, -scale, scale),
        "bias_hh":   jax.random.uniform(ks[4], (4 * HID,), jnp.float32, -scale, scale),
        # nn.Linear(25, 1)
        "w_lin": jax.random.uniform(ks[5], (1, HID), jnp.float32, -scale, scale),
        "b_lin": jax.random.uniform(ks[6], (1,), jnp.float32, -scale, scale),
    }

    tokens = jax.random.randint(ks[7], (B, T), 0, vocab, dtype=jnp.int32)

    out = model_forward(tokens, params)
    jax.block_until_ready(out)

    ref = reference_forward(tokens, params)
    assert out.shape == (B, 1)
    # f32 everywhere with f32 accumulation -> should match the reference very tightly.
    assert jnp.max(jnp.abs(out - ref)) < 1e-4, f"max abs diff {jnp.max(jnp.abs(out - ref))}"

    print("KERNEL_OK")
</pallas_src>

<mosaic_0001>
module attributes {stable_mosaic.version = 11 : i64} {
  func.func @lstm_head_kernel(%arg0: memref<64x40xf32, #tpu.memory_space<vmem>>, %arg1: memref<40x128xf32, #tpu.memory_space<vmem>>, %arg2: memref<32x128xf32, #tpu.memory_space<vmem>>, %arg3: memref<1x128xf32, #tpu.memory_space<vmem>>, %arg4: memref<1x32xf32, #tpu.memory_space<vmem>>, %arg5: memref<1x1xf32, #tpu.memory_space<vmem>>, %arg6: memref<8x1xf32, #tpu.memory_space<vmem>>) attributes {dimension_semantics = [], scalar_prefetch = 0 : i64, scratch_operands = 0 : i64, tpu.core_type = #tpu.core_type<tc>} {
    %c0 = arith.constant 0 : index
    %c0_0 = arith.constant 0 : index
    %0 = vector.load %arg0[%c0, %c0_0] : memref<64x40xf32, #tpu.memory_space<vmem>>, vector<64x40xf32>
    %c0_1 = arith.constant 0 : index
    %c0_2 = arith.constant 0 : index
    %1 = vector.load %arg1[%c0_1, %c0_2] : memref<40x128xf32, #tpu.memory_space<vmem>>, vector<40x128xf32>
    %cst = arith.constant dense<0.000000e+00> : vector<64x128xf32>
    %2 = tpu.matmul %0, %1, %cst {dimension_numbers = #tpu.dot_dimension_numbers<[1], [0], [0], [1], [0, 0, 1, 1], [], []>} : vector<64x40xf32>, vector<40x128xf32>, vector<64x128xf32> -> vector<64x128xf32>
    %c0_3 = arith.constant 0 : index
    %c0_4 = arith.constant 0 : index
    %3 = vector.load %arg3[%c0_3, %c0_4] : memref<1x128xf32, #tpu.memory_space<vmem>>, vector<1x128xf32>
    %4 = vector.broadcast %3 : vector<1x128xf32> to vector<64x128xf32>
    %5 = arith.addf %2, %4 : vector<64x128xf32>
    %c0_5 = arith.constant 0 : index
    %c0_6 = arith.constant 0 : index
    %6 = vector.load %arg2[%c0_5, %c0_6] : memref<32x128xf32, #tpu.memory_space<vmem>>, vector<32x128xf32>
    %7 = tpu.iota {dimensions = array<i32: 1>} : vector<8x128xi32>
    %c64_i32 = arith.constant 64 : i32
    %8 = vector.broadcast %c64_i32 : i32 to vector<8x128xi32>
    %9 = arith.cmpi sge, %7, %8 : vector<8x128xi32>
    %c96_i32 = arith.constant 96 : i32
    %10 = vector.broadcast %c96_i32 : i32 to vector<8x128xi32>
    %11 = arith.cmpi slt, %7, %10 : vector<8x128xi32>
    %12 = arith.andi %9, %11 : vector<8x128xi1>
    %cst_7 = arith.constant 0.000000e+00 : f32
    %13 = vector.broadcast %cst_7 : f32 to vector<8x32xf32>
    %cst_8 = arith.constant 0.000000e+00 : f32
    %14 = vector.broadcast %cst_8 : f32 to vector<8x32xf32>
    %15 = vector.extract_strided_slice %5 {offsets = [0, 0], sizes = [8, 128], strides = [1, 1]} : vector<64x128xf32> to vector<8x128xf32>
    %cst_9 = arith.constant dense<0.000000e+00> : vector<8x128xf32>
    %16 = tpu.matmul %13, %6, %cst_9 {dimension_numbers = #tpu.dot_dimension_numbers<[1], [0], [0], [1], [0, 0, 1, 1], [], []>} : vector<8x32xf32>, vector<32x128xf32>, vector<8x128xf32> -> vector<8x128xf32>
    %17 = arith.addf %15, %16 : vector<8x128xf32>
    %18 = math.tanh %17 : vector<8x128xf32>
    %19 = arith.negf %17 : vector<8x128xf32>
    %20 = math.exp %19 : vector<8x128xf32>
    %cst_10 = arith.constant 1.000000e+00 : f32
    %21 = vector.broadcast %cst_10 : f32 to vector<8x128xf32>
    %22 = arith.addf %21, %20 : vector<8x128xf32>
    %23 = arith.divf %21, %22 : vector<8x128xf32>
    %24 = arith.select %12, %18, %23 : vector<8x128xi1>, vector<8x128xf32>
    %25 = vector.extract_strided_slice %24 {offsets = [0, 0], sizes = [8, 32], strides = [1, 1]} : vector<8x128xf32> to vector<8x32xf32>
    %26 = vector.extract_strided_slice %24 {offsets = [0, 32], sizes = [8, 32], strides = [1, 1]} : vector<8x128xf32> to vector<8x32xf32>
    %27 = vector.extract_strided_slice %24 {offsets = [0, 64], sizes = [8, 32], strides = [1, 1]} : vector<8x128xf32> to vector<8x32xf32>
    %28 = vector.extract_strided_slice %24 {offsets = [0, 96], sizes = [8, 32], strides = [1, 1]} : vector<8x128xf32> to vector<8x32xf32>
    %29 = arith.mulf %26, %14 : vector<8x32xf32>
    %30 = arith.mulf %25, %27 : vector<8x32xf32>
    %31 = arith.addf %29, %30 : vector<8x32xf32>
    %32 = math.tanh %31 : vector<8x32xf32>
    %33 = arith.mulf %28, %32 : vector<8x32xf32>
    %34 = vector.extract_strided_slice %5 {offsets = [8, 0], sizes = [8, 128], strides = [1, 1]} : vector<64x128xf32> to vector<8x128xf32>
    %cst_11 = arith.constant dense<0.000000e+00> : vector<8x128xf32>
    %35 = tpu.matmul %33, %6, %cst_11 {dimension_numbers = #tpu.dot_dimension_numbers<[1], [0], [0], [1], [0, 0, 1, 1], [], []>} : vector<8x32xf32>, vector<32x128xf32>, vector<8x128xf32> -> vector<8x128xf32>
    %36 = arith.addf %34, %35 : vector<8x128xf32>
    %37 = math.tanh %36 : vector<8x128xf32>
    %38 = arith.negf %36 : vector<8x128xf32>
    %39 = math.exp %38 : vector<8x128xf32>
    %cst_12 = arith.constant 1.000000e+00 : f32
    %40 = vector.broadcast %cst_12 : f32 to vector<8x128xf32>
    %41 = arith.addf %40, %39 : vector<8x128xf32>
    %42 = arith.divf %40, %41 : vector<8x128xf32>
    %43 = arith.select %12, %37, %42 : vector<8x128xi1>, vector<8x128xf32>
    %44 = vector.extract_strided_slice %43 {offsets = [0, 0], sizes = [8, 32], strides = [1, 1]} : vector<8x128xf32> to vector<8x32xf32>
    %45 = vector.extract_strided_slice %43 {offsets = [0, 32], sizes = [8, 32], strides = [1, 1]} : vector<8x128xf32> to vector<8x32xf32>
    %46 = vector.extract_strided_slice %43 {offsets = [0, 64], sizes = [8, 32], strides = [1, 1]} : vector<8x128xf32> to vector<8x32xf32>
    %47 = vector.extract_strided_slice %43 {offsets = [0, 96], sizes = [8, 32], strides = [1, 1]} : vector<8x128xf32> to vector<8x32xf32>
    %48 = arith.mulf %45, %31 : vector<8x32xf32>
    %49 = arith.mulf %44, %46 : vector<8x32xf32>
    %50 = arith.addf %48, %49 : vector<8x32xf32>
    %51 = math.tanh %50 : vector<8x32xf32>
    %52 = arith.mulf %47, %51 : vector<8x32xf32>
    %53 = vector.extract_strided_slice %5 {offsets = [16, 0], sizes = [8, 128], strides = [1, 1]} : vector<64x128xf32> to vector<8x128xf32>
    %cst_13 = arith.constant dense<0.000000e+00> : vector<8x128xf32>
    %54 = tpu.matmul %52, %6, %cst_13 {dimension_numbers = #tpu.dot_dimension_numbers<[1], [0], [0], [1], [0, 0, 1, 1], [], []>} : vector<8x32xf32>, vector<32x128xf32>, vector<8x128xf32> -> vector<8x128xf32>
    %55 = arith.addf %53, %54 : vector<8x128xf32>
    %56 = math.tanh %55 : vector<8x128xf32>
    %57 = arith.negf %55 : vector<8x128xf32>
    %58 = math.exp %57 : vector<8x128xf32>
    %cst_14 = arith.constant 1.000000e+00 : f32
    %59 = vector.broadcast %cst_14 : f32 to vector<8x128xf32>
    %60 = arith.addf %59, %58 : vector<8x128xf32>
    %61 = arith.divf %59, %60 : vector<8x128xf32>
    %62 = arith.select %12, %56, %61 : vector<8x128xi1>, vector<8x128xf32>
    %63 = vector.extract_strided_slice %62 {offsets = [0, 0], sizes = [8, 32], strides = [1, 1]} : vector<8x128xf32> to vector<8x32xf32>
    %64 = vector.extract_strided_slice %62 {offsets = [0, 32], sizes = [8, 32], strides = [1, 1]} : vector<8x128xf32> to vector<8x32xf32>
    %65 = vector.extract_strided_slice %62 {offsets = [0, 64], sizes = [8, 32], strides = [1, 1]} : vector<8x128xf32> to vector<8x32xf32>
    %66 = vector.extract_strided_slice %62 {offsets = [0, 96], sizes = [8, 32], strides = [1, 1]} : vector<8x128xf32> to vector<8x32xf32>
    %67 = arith.mulf %64, %50 : vector<8x32xf32>
    %68 = arith.mulf %63, %65 : vector<8x32xf32>
    %69 = arith.addf %67, %68 : vector<8x32xf32>
    %70 = math.tanh %69 : vector<8x32xf32>
    %71 = arith.mulf %66, %70 : vector<8x32xf32>
    %72 = vector.extract_strided_slice %5 {offsets = [24, 0], sizes = [8, 128], strides = [1, 1]} : vector<64x128xf32> to vector<8x128xf32>
    %cst_15 = arith.constant dense<0.000000e+00> : vector<8x128xf32>
    %73 = tpu.matmul %71, %6, %cst_15 {dimension_numbers = #tpu.dot_dimension_numbers<[1], [0], [0], [1], [0, 0, 1, 1], [], []>} : vector<8x32xf32>, vector<32x128xf32>, vector<8x128xf32> -> vector<8x128xf32>
    %74 = arith.addf %72, %73 : vector<8x128xf32>
    %75 = math.tanh %74 : vector<8x128xf32>
    %76 = arith.negf %74 : vector<8x128xf32>
    %77 = math.exp %76 : vector<8x128xf32>
    %cst_16 = arith.constant 1.000000e+00 : f32
    %78 = vector.broadcast %cst_16 : f32 to vector<8x128xf32>
    %79 = arith.addf %78, %77 : vector<8x128xf32>
    %80 = arith.divf %78, %79 : vector<8x128xf32>
    %81 = arith.select %12, %75, %80 : vector<8x128xi1>, vector<8x128xf32>
    %82 = vector.extract_strided_slice %81 {offsets = [0, 0], sizes = [8, 32], strides = [1, 1]} : vector<8x128xf32> to vector<8x32xf32>
    %83 = vector.extract_strided_slice %81 {offsets = [0, 32], sizes = [8, 32], strides = [1, 1]} : vector<8x128xf32> to vector<8x32xf32>
    %84 = vector.extract_strided_slice %81 {offsets = [0, 64], sizes = [8, 32], strides = [1, 1]} : vector<8x128xf32> to vector<8x32xf32>
    %85 = vector.extract_strided_slice %81 {offsets = [0, 96], sizes = [8, 32], strides = [1, 1]} : vector<8x128xf32> to vector<8x32xf32>
    %86 = arith.mulf %83, %69 : vector<8x32xf32>
    %87 = arith.mulf %82, %84 : vector<8x32xf32>
    %88 = arith.addf %86, %87 : vector<8x32xf32>
    %89 = math.tanh %88 : vector<8x32xf32>
    %90 = arith.mulf %85, %89 : vector<8x32xf32>
    %91 = vector.extract_strided_slice %5 {offsets = [32, 0], sizes = [8, 128], strides = [1, 1]} : vector<64x128xf32> to vector<8x128xf32>
    %cst_17 = arith.constant dense<0.000000e+00> : vector<8x128xf32>
    %92 = tpu.matmul %90, %6, %cst_17 {dimension_numbers = #tpu.dot_dimension_numbers<[1], [0], [0], [1], [0, 0, 1, 1], [], []>} : vector<8x32xf32>, vector<32x128xf32>, vector<8x128xf32> -> vector<8x128xf32>
    %93 = arith.addf %91, %92 : vector<8x128xf32>
    %94 = math.tanh %93 : vector<8x128xf32>
    %95 = arith.negf %93 : vector<8x128xf32>
    %96 = math.exp %95 : vector<8x128xf32>
    %cst_18 = arith.constant 1.000000e+00 : f32
    %97 = vector.broadcast %cst_18 : f32 to vector<8x128xf32>
    %98 = arith.addf %97, %96 : vector<8x128xf32>
    %99 = arith.divf %97, %98 : vector<8x128xf32>
    %100 = arith.select %12, %94, %99 : vector<8x128xi1>, vector<8x128xf32>
    %101 = vector.extract_strided_slice %100 {offsets = [0, 0], sizes = [8, 32], strides = [1, 1]} : vector<8x128xf32> to vector<8x32xf32>
    %102 = vector.extract_strided_slice %100 {offsets = [0, 32], sizes = [8, 32], strides = [1, 1]} : vector<8x128xf32> to vector<8x32xf32>
    %103 = vector.extract_strided_slice %100 {offsets = [0, 64], sizes = [8, 32], strides = [1, 1]} : vector<8x128xf32> to vector<8x32xf32>
    %104 = vector.extract_strided_slice %100 {offsets = [0, 96], sizes = [8, 32], strides = [1, 1]} : vector<8x128xf32> to vector<8x32xf32>
    %105 = arith.mulf %102, %88 : vector<8x32xf32>
    %106 = arith.mulf %101, %103 : vector<8x32xf32>
    %107 = arith.addf %105, %106 : vector<8x32xf32>
    %108 = math.tanh %107 : vector<8x32xf32>
    %109 = arith.mulf %104, %108 : vector<8x32xf32>
    %110 = vector.extract_strided_slice %5 {offsets = [40, 0], sizes = [8, 128], strides = [1, 1]} : vector<64x128xf32> to vector<8x128xf32>
    %cst_19 = arith.constant dense<0.000000e+00> : vector<8x128xf32>
    %111 = tpu.matmul %109, %6, %cst_19 {dimension_numbers = #tpu.dot_dimension_numbers<[1], [0], [0], [1], [0, 0, 1, 1], [], []>} : vector<8x32xf32>, vector<32x128xf32>, vector<8x128xf32> -> vector<8x128xf32>
    %112 = arith.addf %110, %111 : vector<8x128xf32>
    %113 = math.tanh %112 : vector<8x128xf32>
    %114 = arith.negf %112 : vector<8x128xf32>
    %115 = math.exp %114 : vector<8x128xf32>
    %cst_20 = arith.constant 1.000000e+00 : f32
    %116 = vector.broadcast %cst_20 : f32 to vector<8x128xf32>
    %117 = arith.addf %116, %115 : vector<8x128xf32>
    %118 = arith.divf %116, %117 : vector<8x128xf32>
    %119 = arith.select %12, %113, %118 : vector<8x128xi1>, vector<8x128xf32>
    %120 = vector.extract_strided_slice %119 {offsets = [0, 0], sizes = [8, 32], strides = [1, 1]} : vector<8x128xf32> to vector<8x32xf32>
    %121 = vector.extract_strided_slice %119 {offsets = [0, 32], sizes = [8, 32], strides = [1, 1]} : vector<8x128xf32> to vector<8x32xf32>
    %122 = vector.extract_strided_slice %119 {offsets = [0, 64], sizes = [8, 32], strides = [1, 1]} : vector<8x128xf32> to vector<8x32xf32>
    %123 = vector.extract_strided_slice %119 {offsets = [0, 96], sizes = [8, 32], strides = [1, 1]} : vector<8x128xf32> to vector<8x32xf32>
    %124 = arith.mulf %121, %107 : vector<8x32xf32>
    %125 = arith.mulf %120, %122 : vector<8x32xf32>
    %126 = arith.addf %124, %125 : vector<8x32xf32>
    %127 = math.tanh %126 : vector<8x32xf32>
    %128 = arith.mulf %123, %127 : vector<8x32xf32>
    %129 = vector.extract_strided_slice %5 {offsets = [48, 0], sizes = [8, 128], strides = [1, 1]} : vector<64x128xf32> to vector<8x128xf32>
    %cst_21 = arith.constant dense<0.000000e+00> : vector<8x128xf32>
    %130 = tpu.matmul %128, %6, %cst_21 {dimension_numbers = #tpu.dot_dimension_numbers<[1], [0], [0], [1], [0, 0, 1, 1], [], []>} : vector<8x32xf32>, vector<32x128xf32>, vector<8x128xf32> -> vector<8x128xf32>
    %131 = arith.addf %129, %130 : vector<8x128xf32>
    %132 = math.tanh %131 : vector<8x128xf32>
    %133 = arith.negf %131 : vector<8x128xf32>
    %134 = math.exp %133 : vector<8x128xf32>
    %cst_22 = arith.constant 1.000000e+00 : f32
    %135 = vector.broadcast %cst_22 : f32 to vector<8x128xf32>
    %136 = arith.addf %135, %134 : vector<8x128xf32>
    %137 = arith.divf %135, %136 : vector<8x128xf32>
    %138 = arith.select %12, %132, %137 : vector<8x128xi1>, vector<8x128xf32>
    %139 = vector.extract_strided_slice %138 {offsets = [0, 0], sizes = [8, 32], strides = [1, 1]} : vector<8x128xf32> to vector<8x32xf32>
    %140 = vector.extract_strided_slice %138 {offsets = [0, 32], sizes = [8, 32], strides = [1, 1]} : vector<8x128xf32> to vector<8x32xf32>
    %141 = vector.extract_strided_slice %138 {offsets = [0, 64], sizes = [8, 32], strides = [1, 1]} : vector<8x128xf32> to vector<8x32xf32>
    %142 = vector.extract_strided_slice %138 {offsets = [0, 96], sizes = [8, 32], strides = [1, 1]} : vector<8x128xf32> to vector<8x32xf32>
    %143 = arith.mulf %140, %126 : vector<8x32xf32>
    %144 = arith.mulf %139, %141 : vector<8x32xf32>
    %145 = arith.addf %143, %144 : vector<8x32xf32>
    %146 = math.tanh %145 : vector<8x32xf32>
    %147 = arith.mulf %142, %146 : vector<8x32xf32>
    %148 = vector.extract_strided_slice %5 {offsets = [56, 0], sizes = [8, 128], strides = [1, 1]} : vector<64x128xf32> to vector<8x128xf32>
    %cst_23 = arith.constant dense<0.000000e+00> : vector<8x128xf32>
    %149 = tpu.matmul %147, %6, %cst_23 {dimension_numbers = #tpu.dot_dimension_numbers<[1], [0], [0], [1], [0, 0, 1, 1], [], []>} : vector<8x32xf32>, vector<32x128xf32>, vector<8x128xf32> -> vector<8x128xf32>
    %150 = arith.addf %148, %149 : vector<8x128xf32>
    %151 = math.tanh %150 : vector<8x128xf32>
    %152 = arith.negf %150 : vector<8x128xf32>
    %153 = math.exp %152 : vector<8x128xf32>
    %cst_24 = arith.constant 1.000000e+00 : f32
    %154 = vector.broadcast %cst_24 : f32 to vector<8x128xf32>
    %155 = arith.addf %154, %153 : vector<8x128xf32>
    %156 = arith.divf %154, %155 : vector<8x128xf32>
    %157 = arith.select %12, %151, %156 : vector<8x128xi1>, vector<8x128xf32>
    %158 = vector.extract_strided_slice %157 {offsets = [0, 0], sizes = [8, 32], strides = [1, 1]} : vector<8x128xf32> to vector<8x32xf32>
    %159 = vector.extract_strided_slice %157 {offsets = [0, 32], sizes = [8, 32], strides = [1, 1]} : vector<8x128xf32> to vector<8x32xf32>
    %160 = vector.extract_strided_slice %157 {offsets = [0, 64], sizes = [8, 32], strides = [1, 1]} : vector<8x128xf32> to vector<8x32xf32>
    %161 = vector.extract_strided_slice %157 {offsets = [0, 96], sizes = [8, 32], strides = [1, 1]} : vector<8x128xf32> to vector<8x32xf32>
    %162 = arith.mulf %159, %145 : vector<8x32xf32>
    %163 = arith.mulf %158, %160 : vector<8x32xf32>
    %164 = arith.addf %162, %163 : vector<8x32xf32>
    %165 = math.tanh %164 : vector<8x32xf32>
    %166 = arith.mulf %161, %165 : vector<8x32xf32>
    %c0_25 = arith.constant 0 : index
    %c0_26 = arith.constant 0 : index
    %167 = vector.load %arg4[%c0_25, %c0_26] : memref<1x32xf32, #tpu.memory_space<vmem>>, vector<1x32xf32>
    %168 = vector.broadcast %167 : vector<1x32xf32> to vector<8x32xf32>
    %169 = arith.mulf %166, %168 : vector<8x32xf32>
    %cst_27 = arith.constant dense<0.000000e+00> : vector<8xf32>
    %170 = vector.multi_reduction <add>, %169, %cst_27 [1] : vector<8x32xf32> to vector<8xf32>
    %171 = vector.shape_cast %170 : vector<8xf32> to vector<8x1xf32>
    %c0_28 = arith.constant 0 : index
    %c0_29 = arith.constant 0 : index
    %172 = vector.load %arg5[%c0_28, %c0_29] : memref<1x1xf32, #tpu.memory_space<vmem>>, vector<1x1xf32>
    %173 = vector.broadcast %172 : vector<1x1xf32> to vector<8x1xf32>
    %174 = arith.addf %171, %173 : vector<8x1xf32>
    %175 = arith.negf %174 : vector<8x1xf32>
    %176 = math.exp %175 : vector<8x1xf32>
    %cst_30 = arith.constant 1.000000e+00 : f32
    %177 = vector.broadcast %cst_30 : f32 to vector<8x1xf32>
    %178 = arith.addf %177, %176 : vector<8x1xf32>
    %179 = arith.divf %177, %178 : vector<8x1xf32>
    %c0_31 = arith.constant 0 : index
    %c0_32 = arith.constant 0 : index
    %180 = vector.load %arg6[%c0_31, %c0_32] : memref<8x1xf32, #tpu.memory_space<vmem>>, vector<8x1xf32>
    tpu.vector_store %arg6[%c0_31, %c0_32], %179 {strides = array<i32>} : memref<8x1xf32, #tpu.memory_space<vmem>>, vector<8x1xf32>,
    return
  }
}

</mosaic_0001>

<bundles_post_ra>
// kernel: tpu_custom_call.1
= control target key start
LH: loop header
LB: loop body
LE: loop exit
PB: predicated region body
PF: predicated region fallthrough
CT: control target
= control target key end

     0   :  { %v1348_v3 = vmov 0.0|0.0   ;;  %vm45_vm0 = vcmask 326656   ;;  %vm1349_vm1 = vmmov 0   ;;  %v1350_v4 = vmov 0.0   ;;  %s1352_s19 = smov 32   ;;  %s1353_s9 = smov 96   ;;  %s1592_s1 = inlined_call_operand.vmem [shape: f32[40,128], index: 1, kind: input, shape index: {}]   ;;  %s1593_s2 = inlined_call_operand.vmem [shape: f32[32,128], index: 2, kind: input, shape index: {}]   ;;  %s1594_s0 = inlined_call_operand.vmem [shape: f32[64,40], index: 0, kind: input, shape index: {}]   ;;  %s1595_s3 = inlined_call_operand.vmem [shape: f32[1,128], index: 3, kind: input, shape index: {}]   ;;  %s1596_s4 = inlined_call_operand.vmem [shape: f32[1,32], index: 4, kind: input, shape index: {}]   ;;  %s1597_s5 = inlined_call_operand.<no memory space> [shape: f32[1,1], index: 5, kind: input, shape index: {}]   ;;  %s1598_s6 = inlined_call_operand.vmem [shape: f32[8,1], index: 6, kind: output, shape index: {}]  }
   0x1   :  { %v33_v0 = vld [vmem:[%s1592_s1] sm:$0xff]  ;;  %v34_v1 = vld [vmem:[%s1592_s1 + $0x8] sm:$0xff]  ;;  %v35_v2 = vld [vmem:[%s1592_s1 + $0x10] sm:$0xff]  ;;  %1226 = vmatprep.subr.bf16.mxu1 %v1348_v3  ;;  %1138 = vmatprep.mubr.msk.f32.mxu1 %vm1349_vm1, %v1350_v4  ;;  %v179_v26 = vlaneseq  ;;  %vm184_vm5 = vcmask 261120   ;;  %v11_v29 = vstv %s1597_s5  ;;  %vm1022_vm6 = vcmask 7168  }
   0x2   :  { %v1218_v5 = vpack.c.bf16 %v34_v1, %v33_v0  ;;  %v36_v6 = vld [vmem:[%s1592_s1 + $0x18] sm:$0xff]  ;;  %v175_v7 = vld [vmem:[%s1593_s2] sm:$0xff]  ;;  %v176_v8 = vld [vmem:[%s1593_s2 + $0x8] sm:$0xff]  ;;  %12 = vst [vmem:[#allocation2] sm:$0x1] %v11_v29 }
   0x3   :  { %v1222_v9 = vpack.c.bf16 %v36_v6, %v35_v2  ;;  %v1410_v10 = vpack.c.bf16 %v176_v8, %v175_v7  ;;  %v25_v11 = vld [vmem:[%s1594_s0] sm:$0xff]  ;;  %v177_v12 = vld [vmem:[%s1593_s2 + $0x10] sm:$0xff]  ;;  %v178_v13 = vld [vmem:[%s1593_s2 + $0x18] sm:$0xff]  ;;  %v180_v28 = vand.u32 127, %v179_v26 }
   0x4   :  { %1219 = vmatprep.subr.bf16.mxu0 %v1218_v5  ;;  %1118 = vmatprep.mubr.msk.f32.mxu0 %vm45_vm0, %v25_v11  ;;  %v1423_v14 = vpack.c.bf16 %v178_v13, %v177_v12  ;;  %v37_v15 = vld [vmem:[%s1592_s1 + $0x20] sm:$0xff]  ;;  %v26_v16 = vld [vmem:[%s1594_s0 + $0x8] sm:$0xff]  ;;  %v27_v57 = vld [vmem:[%s1594_s0 + $0x10] sm:$0xff] }
   0x5   :  { %1221 = vmatpush3.bf16.msra.mxu0 %v1218_v5  ;;  %1228 = vmatpush3.bf16.msra.mxu1 %v1410_v10  ;;  %v1450_v18 = vld [vmem:[%s1595_s3] ss:$0 sm:$0xff]  ;;  %vm181_vm2 = vcmp.ge.s32.totalorder %v180_v28, 64  ;;  %vm182_vm3 = vcmp.lt.s32.totalorder %v180_v28, 96  ;;  %s1351_s3 = smov 64   ;;  %v28_v58 = vld [vmem:[%s1594_s0 + $0x18] sm:$0xff] }
   0x6   :  { %1223 = vmatprep.subr.bf16.mxu0 %v1222_v9  ;;  %1229 = vmatprep.subr.bf16.mxu1 %v1348_v3  ;;  %vm1453_vm4 = vmand %vm181_vm2, %vm182_vm3 }
   0x9   :  { %1225 = vmatpush3.bf16.msra.mxu0 %v1222_v9  ;;  %1231 = vmatpush3.bf16.msra.mxu1 %v1423_v14 }
   0xa   :  { %1116 = vmatprep.subr.mxu0 %v37_v15  ;;  %1232 = vmatprep.subr.bf16.mxu1 %v1348_v3 }
   0xc   :  { %1139 = vmatmul.mubr.f32.vlgmr.msra.gmra.mrb[0].mxu1 %v1350_v4 }
   0xd   :  { %1117 = vmatpush3.msra.mxu0 %v37_v15  ;;  %1234 = vmatpush3.bf16.msra.mxu1 %v1410_v10 }
   0xe   :  { %1119 = vmatmul.mubr.msk.f32.vlgmr.msra.gmra.mrb[0].mxu0 %vm45_vm0, %v26_v16  ;;  %1235 = vmatprep.subr.bf16.mxu1 %v1348_v3 }
   0xf   :  { %1149 = vmatprep.mubr.msk.f32.mxu1 %vm1349_vm1, %v1350_v4  ;;  %1244 = vmatprep.subr.bf16.mxu0 %v1348_v3 }
  0x10   :  { %1246 = vmatpush3.bf16.msra.mxu0 %v1410_v10  ;;  %1121 = vmatprep.mubr.msk.f32.mxu0 %vm45_vm0, %v27_v57 }
  0x11   :  { %1237 = vmatpush3.bf16.msra.mxu1 %v1423_v14  ;;  %1247 = vmatprep.subr.bf16.mxu0 %v1348_v3 }
  0x12   :  { %1238 = vmatprep.subr.bf16.mxu1 %v1348_v3  ;;  %1122 = vmatmul.mubr.msk.f32.gmra.mrb[2].mxu0 %vm45_vm0, %v28_v58 }
  0x14   :  { %1249 = vmatpush3.bf16.msra.mxu0 %v1423_v14 }
  0x15   :  { %1256 = vmatprep.subr.bf16.mxu0 %v1348_v3 }
  0xdf   :  { %v254_v17 = vpop.f32.mrb[0].mxu1 }
  0xe0   :  { %v1140_v19 = vpop.f32.mrb[1].mxu1 }
  0xe1   :  { %v1120_v20 = vpop.f32.mrb[0].mxu0 }
  0xe2   :  { %v136_v21 = vpop.f32.mrb[1].mxu0  ;;  %v142_v42 = vadd.f32 %v1120_v20, %v1450_v18 }
  0xe3   :  { %v137_v22 = vadd.f32 %v1450_v18, %v136_v21  ;;  %v29_v21 = vld [vmem:[%s1594_s0 + $0x20] sm:$0xff] }
  0xe4   :  { %1124 = vmatprep.mubr.msk.f32.mxu0 %vm45_vm0, %v29_v21 }
  0xe5   :  { %v258_v23 = vadd.f32 %v254_v17, %v137_v22  ;;  %v1123_v62 = vpop.f32.mrb[2].mxu0  ;;  %v30_v22 = vld [vmem:[%s1594_s0 + $0x28] sm:$0xff] }
  0xe6   :  { %v146_v63 = vpop.f32.mrb[3].mxu0  ;;  %1125 = vmatmul.mubr.msk.f32.gmra.mrb[4].mxu0 %vm45_vm0, %v30_v22 }
  0xe7   :  { %v1037_v24 = vmul.f32 -1.442695, %v258_v23  ;;  %v147_v1 = vadd.f32 %v1450_v18, %v146_v63 }
  0xe9   :  { %1280 = vpow2.f32 %v1037_v24  ;;  %v32_v24 = vld [vmem:[%s1594_s0 + $0x38] sm:$0xff] }
  0xea   :  { %1282 = vtanh.f32 %v258_v23  ;;  %v31_v23 = vld [vmem:[%s1594_s0 + $0x30] sm:$0xff] }
  0xeb   :  { %1127 = vmatprep.mubr.msk.f32.mxu0 %vm45_vm0, %v31_v23 }
  0xec   :  { %1128 = vmatmul.mubr.msk.f32.gmra.mrb[6].mxu0 %vm45_vm0, %v32_v24 }
  0xed   :  { %1171 = vmatprep.mubr.msk.f32.mxu0 %vm1349_vm1, %v1350_v4 }
  0xf3   :  { %v1281_v25 = vpop.eup %1280 }
  0xf4   :  { %v263_v27 = vadd.f32 1.0, %v1281_v25  ;;  %v1283_v30 = vpop.eup %1282 }
  0xf6   :  { %1284 = vrcp.f32 %v263_v27 }
 0x100   :  { %v1285_v31 = vpop.eup %1284 }
 0x101   :  { %v266_v32 = vsel %vm1453_vm4, %v1283_v30, %v1285_v31 }
 0x102   :  { %269 = vrot.lane.b32.xlu0 %v266_v32, %s1351_s3  ;;  %v267_v35 = vmul.f32 0.0, %v266_v32 }
 0x174   :  { %v270_v33 = vpop.permute.xlu0 %269 }
 0x175   :  { %v272_v34 = vmul.f32 %v270_v33, %v266_v32 }
 0x177   :  { %274 = vrot.lane.b32.xlu0 %v272_v34, %s1352_s19  ;;  %v152_v34 = vadd.f32 %v1123_v62, %v1450_v18 }
 0x1b9   :  { %v1517_v28 = vpop.f32.mrb[4].mxu0 }
 0x1ba   :  { %v156_v30 = vpop.f32.mrb[5].mxu0 }
 0x1bf   :  { %v1519_v31 = vpop.f32.mrb[6].mxu0 }
 0x1e9   :  { %v275_v36 = vpop.permute.xlu0 %274 }
 0x1ea   :  { %v277_v37 = vadd.f32 %v275_v36, %v267_v35 }
 0x1ec   :  { %1286 = vtanh.f32 %v277_v37 }
 0x1f6   :  { %v1287_v38 = vpop.eup %1286 }
 0x1f7   :  { %280 = vrot.lane.b32.xlu1 %v1287_v38, %s1351_s3 }
 0x269   :  { %v281_v39 = vpop.permute.xlu1 %280 }
 0x26a   :  { %v283_v40 = vmul.f32 %v281_v39, %v266_v32  ;;  %v1521_v32 = vpop.f32.mrb[7].mxu0 }
 0x26c   :  { %285 = vrot.lane.b32.xlu1 %v283_v40, %s1352_s19 }
 0x2de   :  { %v286_v41 = vpop.permute.xlu1 %285 }
 0x2df   :  { %1150 = vmatmul.mubr.msk.f32.vlgmr.msra.gmra.mrb[2].mxu1 %vm184_vm5, %v286_v41 }
 0x2e0   :  { %1240 = vmatpush3.bf16.msra.mxu1 %v1410_v10  ;;  %1160 = vmatprep.mubr.msk.f32.mxu1 %vm1349_vm1, %v1350_v4 }
 0x2e1   :  { %1241 = vmatprep.subr.bf16.mxu1 %v1348_v3 }
 0x2e4   :  { %1243 = vmatpush3.bf16.msra.mxu1 %v1423_v14 }
 0x2e5   :  { %1250 = vmatprep.subr.bf16.mxu1 %v1348_v3 }
 0x3b2   :  { %v355_v43 = vpop.f32.mrb[2].mxu1 }
 0x3b3   :  { %v359_v44 = vadd.f32 %v355_v43, %v142_v42  ;;  %v1151_v45 = vpop.f32.mrb[3].mxu1 }
 0x3b5   :  { %v1039_v46 = vmul.f32 -1.442695, %v359_v44 }
 0x3b7   :  { %1288 = vpow2.f32 %v1039_v46 }
 0x3b8   :  { %1290 = vtanh.f32 %v359_v44 }
 0x3c1   :  { %v1289_v47 = vpop.eup %1288 }
 0x3c2   :  { %v364_v48 = vadd.f32 1.0, %v1289_v47  ;;  %v1291_v49 = vpop.eup %1290 }
 0x3c4   :  { %1292 = vrcp.f32 %v364_v48 }
 0x3ce   :  { %v1293_v50 = vpop.eup %1292 }
 0x3cf   :  { %v367_v51 = vsel %vm1453_vm4, %v1291_v49, %v1293_v50 }
 0x3d0   :  { %370 = vrot.lane.b32.xlu0 %v367_v51, %s1351_s3  ;;  %v368_v54 = vmul.f32 %v367_v51, %v277_v37 }
 0x442   :  { %v371_v52 = vpop.permute.xlu0 %370 }
 0x443   :  { %v373_v53 = vmul.f32 %v371_v52, %v367_v51 }
 0x445   :  { %375 = vrot.lane.b32.xlu1 %v373_v53, %s1352_s19  ;;  %v157_v53 = vadd.f32 %v1450_v18, %v156_v30 }
 0x4b7   :  { %v376_v55 = vpop.permute.xlu1 %375 }
 0x4b8   :  { %v378_v56 = vadd.f32 %v376_v55, %v368_v54 }
 0x4ba   :  { %1294 = vtanh.f32 %v378_v56 }
 0x4c4   :  { %v1295_v59 = vpop.eup %1294 }
 0x4c5   :  { %381 = vrot.lane.b32.xlu0 %v1295_v59, %s1351_s3 }
 0x537   :  { %v382_v60 = vpop.permute.xlu0 %381 }
 0x538   :  { %v384_v61 = vmul.f32 %v382_v60, %v367_v51 }
 0x53a   :  { %386 = vrot.lane.b32.xlu1 %v384_v61, %s1352_s19 }
 0x5ac   :  { %v387_v0 = vpop.permute.xlu1 %386 }
 0x5ad   :  { %1161 = vmatmul.mubr.msk.f32.vlgmr.msra.gmra.mrb[4].mxu1 %vm184_vm5, %v387_v0 }
 0x5ae   :  { %1252 = vmatpush3.bf16.msra.mxu1 %v1410_v10  ;;  %1182 = vmatprep.mubr.msk.f32.mxu1 %vm1349_vm1, %v1350_v4 }
 0x5af   :  { %1253 = vmatprep.subr.bf16.mxu1 %v1348_v3 }
 0x5b2   :  { %1255 = vmatpush3.bf16.msra.mxu1 %v1423_v14 }
 0x5b3   :  { %1262 = vmatprep.subr.bf16.mxu1 %v1348_v3 }
 0x680   :  { %v456_v2 = vpop.f32.mrb[4].mxu1 }
 0x681   :  { %v460_v5 = vadd.f32 %v456_v2, %v147_v1  ;;  %v1162_v6 = vpop.f32.mrb[5].mxu1 }
 0x683   :  { %v1041_v7 = vmul.f32 -1.442695, %v460_v5 }
 0x685   :  { %1296 = vpow2.f32 %v1041_v7 }
 0x686   :  { %1298 = vtanh.f32 %v460_v5 }
 0x68f   :  { %v1297_v8 = vpop.eup %1296 }
 0x690   :  { %v465_v9 = vadd.f32 1.0, %v1297_v8  ;;  %v1299_v11 = vpop.eup %1298 }
 0x692   :  { %1300 = vrcp.f32 %v465_v9 }
 0x69c   :  { %v1301_v12 = vpop.eup %1300 }
 0x69d   :  { %v468_v13 = vsel %vm1453_vm4, %v1299_v11, %v1301_v12  ;;  %v162_v11 = vadd.f32 %v1517_v28, %v1450_v18  ;;  %v167_v28 = vadd.f32 %v1450_v18, %v1521_v32 }
 0x69e   :  { %471 = vrot.lane.b32.xlu0 %v468_v13, %s1351_s3  ;;  %v469_v17 = vmul.f32 %v468_v13, %v378_v56 }
 0x710   :  { %v472_v15 = vpop.permute.xlu0 %471 }
 0x711   :  { %v474_v16 = vmul.f32 %v472_v15, %v468_v13 }
 0x713   :  { %476 = vrot.lane.b32.xlu1 %v474_v16, %s1352_s19 }
 0x785   :  { %v477_v19 = vpop.permute.xlu1 %476 }
 0x786   :  { %v479_v20 = vadd.f32 %v477_v19, %v469_v17 }
 0x788   :  { %1302 = vtanh.f32 %v479_v20 }
 0x792   :  { %v1303_v25 = vpop.eup %1302 }
 0x793   :  { %482 = vrot.lane.b32.xlu0 %v1303_v25, %s1351_s3 }
 0x805   :  { %v483_v26 = vpop.permute.xlu0 %482 }
 0x806   :  { %v485_v27 = vmul.f32 %v483_v26, %v468_v13 }
 0x808   :  { %487 = vrot.lane.b32.xlu1 %v485_v27, %s1352_s19 }
 0x87a   :  { %v488_v33 = vpop.permute.xlu1 %487 }
 0x87b   :  { %1172 = vmatmul.mubr.msk.f32.vlgmr.msra.gmra.mrb[8].mxu0 %vm184_vm5, %v488_v33 }
 0x87c   :  { %1258 = vmatpush3.bf16.msra.mxu0 %v1410_v10  ;;  %1193 = vmatprep.mubr.msk.f32.mxu0 %vm1349_vm1, %v1350_v4 }
 0x87d   :  { %1259 = vmatprep.subr.bf16.mxu0 %v1348_v3 }
 0x880   :  { %1261 = vmatpush3.bf16.msra.mxu0 %v1423_v14 }
 0x881   :  { %1268 = vmatprep.subr.bf16.mxu0 %v1348_v3 }
 0x94e   :  { %v557_v35 = vpop.f32.mrb[8].mxu0 }
 0x94f   :  { %v561_v36 = vadd.f32 %v557_v35, %v152_v34  ;;  %v1173_v37 = vpop.f32.mrb[9].mxu0 }
 0x951   :  { %v1043_v38 = vmul.f32 -1.442695, %v561_v36 }
 0x953   :  { %1304 = vpow2.f32 %v1043_v38 }
 0x954   :  { %1306 = vtanh.f32 %v561_v36 }
 0x95d   :  { %v1305_v39 = vpop.eup %1304 }
 0x95e   :  { %v566_v40 = vadd.f32 1.0, %v1305_v39  ;;  %v1307_v41 = vpop.eup %1306 }
 0x960   :  { %1308 = vrcp.f32 %v566_v40 }
 0x96a   :  { %v1309_v42 = vpop.eup %1308 }
 0x96b   :  { %v569_v43 = vsel %vm1453_vm4, %v1307_v41, %v1309_v42 }
 0x96c   :  { %572 = vrot.lane.b32.xlu0 %v569_v43, %s1351_s3  ;;  %v570_v46 = vmul.f32 %v569_v43, %v479_v20 }
 0x9de   :  { %v573_v44 = vpop.permute.xlu0 %572 }
 0x9df   :  { %v575_v45 = vmul.f32 %v573_v44, %v569_v43 }
 0x9e1   :  { %577 = vrot.lane.b32.xlu1 %v575_v45, %s1352_s19 }
 0xa53   :  { %v578_v47 = vpop.permute.xlu1 %577 }
 0xa54   :  { %v580_v48 = vadd.f32 %v578_v47, %v570_v46 }
 0xa56   :  { %1310 = vtanh.f32 %v580_v48 }
 0xa60   :  { %v1311_v49 = vpop.eup %1310 }
 0xa61   :  { %583 = vrot.lane.b32.xlu0 %v1311_v49, %s1351_s3  ;;  %v172_v49 = vadd.f32 %v1519_v31, %v1450_v18  ;;  %v1052_v18 = vld [vmem:[%s1596_s4] ss:$0 sm:$0xff] }
 0xad3   :  { %v584_v50 = vpop.permute.xlu0 %583 }
 0xad4   :  { %v586_v51 = vmul.f32 %v584_v50, %v569_v43 }
 0xad6   :  { %588 = vrot.lane.b32.xlu1 %v586_v51, %s1352_s19 }
 0xb48   :  { %v589_v52 = vpop.permute.xlu1 %588 }
 0xb49   :  { %1183 = vmatmul.mubr.msk.f32.vlgmr.msra.gmra.mrb[6].mxu1 %vm184_vm5, %v589_v52 }
 0xb4a   :  { %1264 = vmatpush3.bf16.msra.mxu1 %v1410_v10  ;;  %1204 = vmatprep.mubr.msk.f32.mxu1 %vm1349_vm1, %v1350_v4 }
 0xb4b   :  { %1265 = vmatprep.subr.bf16.mxu1 %v1348_v3 }
 0xb4e   :  { %1267 = vmatpush3.bf16.msra.mxu1 %v1423_v14 }
 0xc1c   :  { %v658_v54 = vpop.f32.mrb[6].mxu1 }
 0xc1d   :  { %v662_v55 = vadd.f32 %v658_v54, %v157_v53  ;;  %v1184_v56 = vpop.f32.mrb[7].mxu1 }
 0xc1f   :  { %v1045_v57 = vmul.f32 -1.442695, %v662_v55 }
 0xc21   :  { %1312 = vpow2.f32 %v1045_v57 }
 0xc22   :  { %1314 = vtanh.f32 %v662_v55 }
 0xc2b   :  { %v1313_v58 = vpop.eup %1312 }
 0xc2c   :  { %v667_v59 = vadd.f32 1.0, %v1313_v58  ;;  %v1315_v60 = vpop.eup %1314 }
 0xc2e   :  { %1316 = vrcp.f32 %v667_v59 }
 0xc38   :  { %v1317_v61 = vpop.eup %1316 }
 0xc39   :  { %v670_v62 = vsel %vm1453_vm4, %v1315_v60, %v1317_v61 }
 0xc3a   :  { %673 = vrot.lane.b32.xlu0 %v670_v62, %s1351_s3  ;;  %v671_v1 = vmul.f32 %v670_v62, %v580_v48 }
 0xcac   :  { %v674_v63 = vpop.permute.xlu0 %673 }
 0xcad   :  { %v676_v0 = vmul.f32 %v674_v63, %v670_v62 }
 0xcaf   :  { %678 = vrot.lane.b32.xlu1 %v676_v0, %s1352_s19 }
 0xd21   :  { %v679_v2 = vpop.permute.xlu1 %678 }
 0xd22   :  { %v681_v5 = vadd.f32 %v679_v2, %v671_v1 }
 0xd24   :  { %1318 = vtanh.f32 %v681_v5 }
 0xd2e   :  { %v1319_v6 = vpop.eup %1318 }
 0xd2f   :  { %684 = vrot.lane.b32.xlu0 %v1319_v6, %s1351_s3 }
 0xda1   :  { %v685_v7 = vpop.permute.xlu0 %684 }
 0xda2   :  { %v687_v8 = vmul.f32 %v685_v7, %v670_v62 }
 0xda4   :  { %689 = vrot.lane.b32.xlu1 %v687_v8, %s1352_s19  ;;  %v1053_v8 = vld [vmem:[#allocation2] ss:$0 sm:$0xff] }
 0xe16   :  { %v690_v9 = vpop.permute.xlu1 %689 }
 0xe17   :  { %1194 = vmatmul.mubr.msk.f32.vlgmr.msra.gmra.mrb[10].mxu0 %vm184_vm5, %v690_v9 }
 0xe18   :  { %1270 = vmatpush3.bf16.msra.mxu0 %v1410_v10  ;;  %1215 = vmatprep.mubr.msk.f32.mxu0 %vm1349_vm1, %v1350_v4 }
 0xe19   :  { %1271 = vmatprep.subr.bf16.mxu0 %v1348_v3 }
 0xe1c   :  { %1273 = vmatpush3.bf16.msra.mxu0 %v1423_v14 }
 0xeea   :  { %v759_v12 = vpop.f32.mrb[10].mxu0 }
 0xeeb   :  { %v763_v13 = vadd.f32 %v759_v12, %v162_v11  ;;  %v1195_v15 = vpop.f32.mrb[11].mxu0 }
 0xeed   :  { %v1047_v16 = vmul.f32 -1.442695, %v763_v13 }
 0xeef   :  { %1320 = vpow2.f32 %v1047_v16 }
 0xef0   :  { %1322 = vtanh.f32 %v763_v13 }
 0xef9   :  { %v1321_v17 = vpop.eup %1320 }
 0xefa   :  { %v768_v19 = vadd.f32 1.0, %v1321_v17  ;;  %v1323_v10 = vpop.eup %1322 }
 0xefc   :  { %1324 = vrcp.f32 %v768_v19 }
 0xf06   :  { %v1325_v20 = vpop.eup %1324 }
 0xf07   :  { %v771_v4 = vsel %vm1453_vm4, %v1323_v10, %v1325_v20 }
 0xf08   :  { %774 = vrot.lane.b32.xlu0 %v771_v4, %s1351_s3  ;;  %v772_v21 = vmul.f32 %v771_v4, %v681_v5 }
 0xf7a   :  { %v775_v3 = vpop.permute.xlu0 %774 }
 0xf7b   :  { %v777_v14 = vmul.f32 %v775_v3, %v771_v4 }
 0xf7d   :  { %779 = vrot.lane.b32.xlu1 %v777_v14, %s1352_s19 }
 0xfef   :  { %v780_v22 = vpop.permute.xlu1 %779 }
 0xff0   :  { %v782_v23 = vadd.f32 %v780_v22, %v772_v21 }
 0xff2   :  { %1326 = vtanh.f32 %v782_v23 }
 0xffc   :  { %v1327_v24 = vpop.eup %1326 }
 0xffd   :  { %785 = vrot.lane.b32.xlu0 %v1327_v24, %s1351_s3 }
0x106f   :  { %v786_v25 = vpop.permute.xlu0 %785 }
0x1070   :  { %v788_v26 = vmul.f32 %v786_v25, %v771_v4 }
0x1072   :  { %790 = vrot.lane.b32.xlu1 %v788_v26, %s1352_s19 }
0x10e4   :  { %v791_v27 = vpop.permute.xlu1 %790 }
0x10e5   :  { %1205 = vmatmul.mubr.msk.f32.vlgmr.msra.gmra.mrb[8].mxu1 %vm184_vm5, %v791_v27 }
0x11b8   :  { %v860_v30 = vpop.f32.mrb[8].mxu1 }
0x11b9   :  { %v864_v33 = vadd.f32 %v860_v30, %v167_v28  ;;  %v1206_v34 = vpop.f32.mrb[9].mxu1 }
0x11bb   :  { %v1049_v35 = vmul.f32 -1.442695, %v864_v33 }
0x11bd   :  { %1328 = vpow2.f32 %v1049_v35 }
0x11be   :  { %1330 = vtanh.f32 %v864_v33 }
0x11c7   :  { %v1329_v36 = vpop.eup %1328 }
0x11c8   :  { %v869_v37 = vadd.f32 1.0, %v1329_v36  ;;  %v1331_v38 = vpop.eup %1330 }
0x11ca   :  { %1332 = vrcp.f32 %v869_v37 }
0x11d4   :  { %v1333_v39 = vpop.eup %1332 }
0x11d5   :  { %v872_v40 = vsel %vm1453_vm4, %v1331_v38, %v1333_v39 }
0x11d6   :  { %875 = vrot.lane.b32.xlu0 %v872_v40, %s1351_s3  ;;  %v873_v32 = vmul.f32 %v872_v40, %v782_v23 }
0x1248   :  { %v876_v41 = vpop.permute.xlu0 %875 }
0x1249   :  { %v878_v42 = vmul.f32 %v876_v41, %v872_v40 }
0x124b   :  { %880 = vrot.lane.b32.xlu1 %v878_v42, %s1352_s19 }
0x12bd   :  { %v881_v43 = vpop.permute.xlu1 %880 }
0x12be   :  { %v883_v44 = vadd.f32 %v881_v43, %v873_v32 }
0x12c0   :  { %1334 = vtanh.f32 %v883_v44 }
0x12ca   :  { %v1335_v45 = vpop.eup %1334 }
0x12cb   :  { %886 = vrot.lane.b32.xlu0 %v1335_v45, %s1351_s3 }
0x133d   :  { %v887_v46 = vpop.permute.xlu0 %886 }
0x133e   :  { %v889_v47 = vmul.f32 %v887_v46, %v872_v40 }
0x1340   :  { %891 = vrot.lane.b32.xlu1 %v889_v47, %s1352_s19 }
0x13b2   :  { %v892_v48 = vpop.permute.xlu1 %891 }
0x13b3   :  { %1216 = vmatmul.mubr.msk.f32.vlgmr.msra.gmra.mrb[12].mxu0 %vm184_vm5, %v892_v48 }
0x1486   :  { %v961_v50 = vpop.f32.mrb[12].mxu0 }
0x1487   :  { %v965_v51 = vadd.f32 %v961_v50, %v172_v49  ;;  %v1217_v52 = vpop.f32.mrb[13].mxu0 }
0x1489   :  { %v1051_v53 = vmul.f32 -1.442695, %v965_v51 }
0x148b   :  { %1336 = vpow2.f32 %v1051_v53 }
0x148c   :  { %1338 = vtanh.f32 %v965_v51 }
0x1495   :  { %v1337_v54 = vpop.eup %1336 }
0x1496   :  { %v970_v55 = vadd.f32 1.0, %v1337_v54  ;;  %v1339_v56 = vpop.eup %1338 }
0x1498   :  { %1340 = vrcp.f32 %v970_v55 }
0x14a2   :  { %v1341_v57 = vpop.eup %1340 }
0x14a3   :  { %v973_v58 = vsel %vm1453_vm4, %v1339_v56, %v1341_v57 }
0x14a4   :  { %976 = vrot.lane.b32.xlu0 %v973_v58, %s1351_s3  ;;  %v974_v31 = vmul.f32 %v973_v58, %v883_v44 }
0x1516   :  { %v977_v59 = vpop.permute.xlu0 %976 }
0x1517   :  { %v979_v60 = vmul.f32 %v977_v59, %v973_v58 }
0x1519   :  { %981 = vrot.lane.b32.xlu1 %v979_v60, %s1352_s19 }
0x151d   :  { %997 = vrot.lane.b32.xlu1 %v1052_v18, %s1353_s9 }
0x158b   :  { %v982_v61 = vpop.permute.xlu1 %981 }
0x158c   :  { %v984_v62 = vadd.f32 %v982_v61, %v974_v31 }
0x158e   :  { %1342 = vtanh.f32 %v984_v62 }
0x158f   :  { %v998_v1 = vpop.permute.xlu1 %997 }
0x1598   :  { %v1343_v63 = vpop.eup %1342 }
0x1599   :  { %987 = vrot.lane.b32.xlu0 %v1343_v63, %s1351_s3 }
0x160b   :  { %v988_v0 = vpop.permute.xlu0 %987 }
0x160c   :  { %v990_v2 = vmul.f32 %v988_v0, %v973_v58 }
0x160e   :  { %v1000_v5 = vmul.f32 %v998_v1, %v990_v2 }
0x1610   :  { %1002 = vrot.lane.b32.xlu0 %v1000_v5, %s1352_s19 }
0x1682   :  { %v1003_v6 = vpop.permute.xlu0 %1002 }
0x1683   :  { %v1005_v7 = vsel %vm184_vm5, %v1003_v6, 0.0 }
0x1684   :  { %1006 = vadd.xlane.f32.xlu1 %v1005_v7 }
0x1711   :  { %v1007_v9 = vpop.xlane.xlu1 %1006 }
0x1712   :  { %v1015_v11 = vadd.f32 %v1053_v8, %v1007_v9 }
0x1714   :  { %v1054_v12 = vmul.f32 -1.442695, %v1015_v11 }
0x1716   :  { %1344 = vpow2.f32 %v1054_v12 }
0x1720   :  { %v1345_v13 = vpop.eup %1344 }
0x1721   :  { %v1019_v15 = vadd.f32 1.0, %v1345_v13 }
0x1723   :  { %1346 = vrcp.f32 %v1019_v15 }
0x172d   :  { %v1347_v16 = vpop.eup %1346 }
0x172e   :  { %1023 = vst.msk [vmem:[%s1598_s6] sm:$0xff] %vm1022_vm6, %v1347_v16 }

</bundles_post_ra>
